<compile_context>
chip_gen: v7x
topology: tpu7x:2x2x1
jax: 0.10.0
libtpu: 0.0.40
codegen_flags: <defaults>
</compile_context>

<pallas_src>
import functools
import math

import jax
import jax.numpy as jnp
from jax.experimental import pallas as pl
from jax.experimental.pallas import tpu as pltpu


_VMEM_LIMIT_BYTES = 32 * 1024 * 1024    # raise v5e's 16 MiB default; safe on v7x (64 MiB)
_INPUT_BLOCK_BUDGET = 16 * 1024 * 1024  # bytes for 2 inputs x 2 pipeline buffers of tiles


# ----------------------------------------------------------------------------- kernels
def _tversky_kernel_3d(pred_ref, mask_ref, tl_ref, tp_acc, ps_acc, ms_acc,
                       *, alpha, beta, gamma, eps, s_total, s_block):
    """pred_ref/mask_ref: (tB, tS, 128) tile of the (B, S, 128)-viewed inputs.
    tl_ref: (1, tB, 1) per-batch-tile Tversky loss, written at the last reduction step.
    tp/ps/ms_acc: (tB, 128) f32 lane-resident accumulators."""
    j = pl.program_id(1)

    @pl.when(j == 0)
    def _():
        tp_acc[...] = jnp.zeros_like(tp_acc)
        ps_acc[...] = jnp.zeros_like(ps_acc)
        ms_acc[...] = jnp.zeros_like(ms_acc)

    p = pred_ref[...].astype(jnp.float32)             # (tB, tS, 128)
    m = mask_ref[...].astype(jnp.float32)

    if s_total % s_block != 0:                        # static: ragged tail along S
        sub = jax.lax.broadcasted_iota(jnp.int32, p.shape, 1)
        keep = (sub + j * s_block) < s_total
        p = jnp.where(keep, p, 0.0)
        m = jnp.where(keep, m, 0.0)

    # lane-resident partial sums; cross-lane reduce happens only in the finalize.
    tp_acc[...] += jnp.sum(p * m, axis=1)             # (tB, 128)
    ps_acc[...] += jnp.sum(p, axis=1)
    ms_acc[...] += jnp.sum(m, axis=1)

    @pl.when(j == pl.num_programs(1) - 1)
    def _():
        tp = jnp.sum(tp_acc[...], axis=1, keepdims=True)   # (tB, 1)
        ps = jnp.sum(ps_acc[...], axis=1, keepdims=True)
        ms = jnp.sum(ms_acc[...], axis=1, keepdims=True)
        fp = ps - tp                                        # sum(pred * (1 - mask))
        fn = ms - tp                                        # sum((1 - pred) * mask)
        tl = 1.0 - (tp + eps) / (tp + beta * fn + gamma * fp + eps)
        tl = jnp.where(ms > 0.0, tl, alpha * tl)
        tl_ref[...] = tl[None]


def _tversky_kernel_2d(pred_ref, mask_ref, tl_ref, tp_acc, ps_acc, ms_acc,
                       *, alpha, beta, gamma, eps, d_total, d_block):
    """Fallback for D not a multiple of 128. pred_ref/mask_ref: (B, tD) chunk."""
    j = pl.program_id(0)

    @pl.when(j == 0)
    def _():
        tp_acc[...] = jnp.zeros_like(tp_acc)
        ps_acc[...] = jnp.zeros_like(ps_acc)
        ms_acc[...] = jnp.zeros_like(ms_acc)

    p = pred_ref[...].astype(jnp.float32)             # (B, tD)
    m = mask_ref[...].astype(jnp.float32)

    if d_total % d_block != 0:                        # static: ragged tail along D
        lane = jax.lax.broadcasted_iota(jnp.int32, p.shape, 1)
        keep = (lane + j * d_block) < d_total
        p = jnp.where(keep, p, 0.0)
        m = jnp.where(keep, m, 0.0)

    tp_acc[...] += jnp.sum(p * m, axis=1, keepdims=True)
    ps_acc[...] += jnp.sum(p, axis=1, keepdims=True)
    ms_acc[...] += jnp.sum(m, axis=1, keepdims=True)

    @pl.when(j == pl.num_programs(0) - 1)
    def _():
        tp = tp_acc[...]
        ps = ps_acc[...]
        ms = ms_acc[...]
        fp = ps - tp
        fn = ms - tp
        tl = 1.0 - (tp + eps) / (tp + beta * fn + gamma * fp + eps)
        tl = jnp.where(ms > 0.0, tl, alpha * tl)
        tl_ref[...] = tl


# ----------------------------------------------------------------------------- helpers
def _round_down(x, m):
    return (x // m) * m


def _pick_batch_tile(B):
    """Largest batch tile <= 8 that divides B and leaves >= 2 batch blocks
    (so the leading 'parallel' grid axis can use both v7x TensorCores)."""
    if B <= 1:
        return 1
    cands = [t for t in range(1, min(B, 8) + 1) if B % t == 0 and B // t >= 2]
    return max(cands)


# ----------------------------------------------------------------------------- wrapper
def tversky_loss(pred, mask, *, alpha=1.0, beta=0.5, gamma=0.5,
                 reduction="mean", eps=1.0, block_s=None, block_d=None):
    """JAX/Pallas equivalent of TverskyLoss.forward.

    Pass pred/mask in their narrowest native dtype (bf16 / f32, int or float mask);
    the kernel casts to f32 in VMEM, so no wrapper-side cast (= no extra HBM pass).
    `block_s` / `block_d` optionally cap the tile sizes (mainly for testing)."""
    assert pred.shape == mask.shape, (
        f"Prediction and Mask should have the same dimensions! "
        f"Given: Prediction {pred.shape} / Mask {mask.shape}")

    B = pred.shape[0]
    D = int(math.prod(pred.shape[1:])) if pred.ndim > 1 else 1

    item = pred.dtype.itemsize + mask.dtype.itemsize
    cost = pl.CostEstimate(flops=4 * B * D, transcendentals=0,
                           bytes_accessed=B * D * item + B * 4)
    kw = dict(alpha=float(alpha), beta=float(beta), gamma=float(gamma), eps=float(eps))

    if D % 128 == 0:
        # ---- main path: (B, S, 128) view, sublane-dense tiles, parallel batch axis
        S = D // 128
        tB = _pick_batch_tile(B)
        cap = max(8, _round_down(_INPUT_BLOCK_BUDGET // (2 * item * tB * 128), 8))
        if block_s is not None:
            cap = min(cap, max(8, _round_down(int(block_s), 8)))
        tS = min(S, cap)                       # multiple of 8, or == S (full dim)
        n_b = pl.cdiv(B, tB)                   # == B // tB (tB divides B)
        n_s = pl.cdiv(S, tS)

        kernel = functools.partial(_tversky_kernel_3d, s_total=S, s_block=tS, **kw)
        out = pl.pallas_call(
            kernel,
            out_shape=jax.ShapeDtypeStruct((n_b, tB, 1), jnp.float32),
            grid_spec=pltpu.PrefetchScalarGridSpec(
                num_scalar_prefetch=0,
                grid=(n_b, n_s),
                in_specs=[pl.BlockSpec((tB, tS, 128), lambda i, j: (i, j, 0))] * 2,
                out_specs=pl.BlockSpec((1, tB, 1), lambda i, j: (i, 0, 0)),
                scratch_shapes=[pltpu.VMEM((tB, 128), jnp.float32)] * 3,
            ),
            compiler_params=pltpu.CompilerParams(
                dimension_semantics=("parallel", "arbitrary"),
                vmem_limit_bytes=_VMEM_LIMIT_BYTES),
            cost_estimate=cost,
        )(pred.reshape(B, S, 128), mask.reshape(B, S, 128))
        tl = out.reshape(-1)[:B]
    else:
        # ---- fallback path: ragged D, 2-D (B, tD) tiles, in-kernel lane-tail mask
        # TODO(synk): also tile the batch axis in this ragged-D fallback for very large B.
        tD_cap = max(128, _round_down(_INPUT_BLOCK_BUDGET // (2 * item * B), 128))
        if block_d is not None:
            tD_cap = min(tD_cap, max(128, _round_down(int(block_d), 128)))
        tD = min(((D + 127) // 128) * 128, tD_cap)

        kernel = functools.partial(_tversky_kernel_2d, d_total=D, d_block=tD, **kw)
        out = pl.pallas_call(
            kernel,
            out_shape=jax.ShapeDtypeStruct((B, 1), jnp.float32),
            grid_spec=pltpu.PrefetchScalarGridSpec(
                num_scalar_prefetch=0,
                grid=(pl.cdiv(D, tD),),
                in_specs=[pl.BlockSpec((B, tD), lambda j: (0, j))] * 2,
                out_specs=pl.BlockSpec((B, 1), lambda j: (0, 0)),
                scratch_shapes=[pltpu.VMEM((B, 1), jnp.float32)] * 3,
            ),
            compiler_params=pltpu.CompilerParams(
                dimension_semantics=("arbitrary",),
                vmem_limit_bytes=_VMEM_LIMIT_BYTES),
            cost_estimate=cost,
        )(pred.reshape(B, D), mask.reshape(B, D))
        tl = out[:, 0]

    if reduction == "mean":
        return jnp.mean(tl)
    elif reduction == "sum":
        return jnp.sum(tl)
    return tl   # 'none'


# ----------------------------------------------------------------------------- reference
def _ref_tversky(pred, mask, alpha=1.0, beta=0.5, gamma=0.5, reduction="mean", eps=1.0):
    axes = tuple(range(1, pred.ndim))
    p = pred.astype(jnp.float32)
    m = mask.astype(jnp.float32)
    tp = jnp.sum(p * m, axis=axes)
    fp = jnp.sum(p * (1.0 - m), axis=axes)
    fn = jnp.sum((1.0 - p) * m, axis=axes)
    tl = 1.0 - (tp + eps) / (tp + beta * fn + gamma * fp + eps)
    tl = jnp.where(jnp.sum(m, axis=axes) > 0.0, tl, alpha * tl)
    if reduction == "mean":
        return tl.mean()
    if reduction == "sum":
        return tl.sum()
    return tl


if __name__ == "__main__":
    key = jax.random.PRNGKey(0)
    k1, k2, k3, k4 = jax.random.split(key, 4)

    # pred/mask: (Batch x Output Dimension) -> batch=2, channels=4, spatial=16x16
    B, C, H, W = 2, 4, 16, 16
    pred = jax.nn.sigmoid(jax.random.normal(k1, (B, C, H, W), dtype=jnp.float32))
    mask = (jax.random.uniform(k2, (B, C, H, W)) > 0.7).astype(jnp.float32)

    # 1) defaults, mean reduction, main (B, S, 128) path
    out = jax.block_until_ready(tversky_loss(pred, mask))
    ref = _ref_tversky(pred, mask)
    assert jnp.allclose(out, ref, rtol=1e-5, atol=1e-5), (out, ref)

    # 2) non-default params, empty-mask batch element (alpha branch), bf16 inputs,
    #    reduction='none' -- no wrapper-side cast, kernel casts in VMEM
    mask2 = mask.at[1].set(0.0)
    out2 = jax.block_until_ready(
        tversky_loss(pred.astype(jnp.bfloat16), mask2.astype(jnp.bfloat16),
                     alpha=0.5, beta=0.3, gamma=0.7, reduction="none"))
    ref2 = _ref_tversky(pred.astype(jnp.bfloat16), mask2.astype(jnp.bfloat16),
                        alpha=0.5, beta=0.3, gamma=0.7, reduction="none")
    assert jnp.allclose(out2, ref2, rtol=1e-5, atol=1e-5), (out2, ref2)

    # 3) multi-step accumulation + ragged S tail: D = 4*16*24 = 1536 -> S = 12,
    #    block_s=8 -> 2 reduction steps with a masked sublane tail; B=3 parallel axis
    pred3 = jax.nn.sigmoid(jax.random.normal(k3, (3, 4, 16, 24), dtype=jnp.float32))
    mask3 = (jax.random.uniform(k4, (3, 4, 16, 24)) > 0.5).astype(jnp.float32)
    out3 = jax.block_until_ready(tversky_loss(pred3, mask3, reduction="sum", block_s=8))
    ref3 = _ref_tversky(pred3, mask3, reduction="sum")
    assert jnp.allclose(out3, ref3, rtol=1e-5, atol=1e-5), (out3, ref3)

    # 4) ragged-D fallback path (D = 5*7*9 = 315, not a multiple of 128),
    #    multi-step grid with a masked lane tail
    pred4 = jax.nn.sigmoid(jax.random.normal(k3, (2, 5, 7, 9), dtype=jnp.float32))
    mask4 = (jax.random.uniform(k4, (2, 5, 7, 9)) > 0.6).astype(jnp.float32)
    out4 = jax.block_until_ready(tversky_loss(pred4, mask4, reduction="none", block_d=128))
    ref4 = _ref_tversky(pred4, mask4, reduction="none")
    assert jnp.allclose(out4, ref4, rtol=1e-5, atol=1e-5), (out4, ref4)

    print("KERNEL_OK")
</pallas_src>

<mosaic_0001>
module attributes {stable_mosaic.version = 11 : i64} {
  func.func @_tversky_kernel_3d(%arg0: i32, %arg1: i32, %arg2: memref<1x8x128xf32, #tpu.memory_space<vmem>>, %arg3: memref<1x8x128xf32, #tpu.memory_space<vmem>>, %arg4: memref<1x1x1xf32, #tpu.memory_space<vmem>>, %arg5: memref<1x128xf32, #tpu.memory_space<vmem>>, %arg6: memref<1x128xf32, #tpu.memory_space<vmem>>, %arg7: memref<1x128xf32, #tpu.memory_space<vmem>>) attributes {dimension_semantics = [#tpu.dimension_semantics<parallel>, #tpu.dimension_semantics<arbitrary>], iteration_bounds = array<i64: 2, 1>, scalar_prefetch = 0 : i64, scratch_operands = 3 : i64, tpu.core_type = #tpu.core_type<tc>, window_params = [{transform_indices = @transform_0, window_bounds = array<i64: 1, 8, 128>}, {transform_indices = @transform_1, window_bounds = array<i64: 1, 8, 128>}, {transform_indices = @transform_2, window_bounds = array<i64: 1, 1, 1>}]} {
    %c0_i32 = arith.constant 0 : i32
    %0 = arith.cmpi eq, %arg1, %c0_i32 : i32
    %1 = arith.extui %0 : i1 to i32
    %c0_i32_0 = arith.constant 0 : i32
    %2 = arith.cmpi ne, %1, %c0_i32_0 : i32
    scf.if %2 {
      %cst_22 = arith.constant 0.000000e+00 : f32
      %21 = vector.broadcast %cst_22 : f32 to vector<1x128xf32>
      %c0_23 = arith.constant 0 : index
      %c0_24 = arith.constant 0 : index
      %22 = vector.load %arg5[%c0_23, %c0_24] : memref<1x128xf32, #tpu.memory_space<vmem>>, vector<1x128xf32>
      tpu.vector_store %arg5[%c0_23, %c0_24], %21 {strides = array<i32>} : memref<1x128xf32, #tpu.memory_space<vmem>>, vector<1x128xf32>,
      %cst_25 = arith.constant 0.000000e+00 : f32
      %23 = vector.broadcast %cst_25 : f32 to vector<1x128xf32>
      %c0_26 = arith.constant 0 : index
      %c0_27 = arith.constant 0 : index
      %24 = vector.load %arg6[%c0_26, %c0_27] : memref<1x128xf32, #tpu.memory_space<vmem>>, vector<1x128xf32>
      tpu.vector_store %arg6[%c0_26, %c0_27], %23 {strides = array<i32>} : memref<1x128xf32, #tpu.memory_space<vmem>>, vector<1x128xf32>,
      %cst_28 = arith.constant 0.000000e+00 : f32
      %25 = vector.broadcast %cst_28 : f32 to vector<1x128xf32>
      %c0_29 = arith.constant 0 : index
      %c0_30 = arith.constant 0 : index
      %26 = vector.load %arg7[%c0_29, %c0_30] : memref<1x128xf32, #tpu.memory_space<vmem>>, vector<1x128xf32>
      tpu.vector_store %arg7[%c0_29, %c0_30], %25 {strides = array<i32>} : memref<1x128xf32, #tpu.memory_space<vmem>>, vector<1x128xf32>,
    } else {
    }
    %c0 = arith.constant 0 : index
    %c0_1 = arith.constant 0 : index
    %c0_2 = arith.constant 0 : index
    %3 = vector.load %arg2[%c0, %c0_1, %c0_2] : memref<1x8x128xf32, #tpu.memory_space<vmem>>, vector<1x8x128xf32>
    %c0_3 = arith.constant 0 : index
    %c0_4 = arith.constant 0 : index
    %c0_5 = arith.constant 0 : index
    %4 = vector.load %arg3[%c0_3, %c0_4, %c0_5] : memref<1x8x128xf32, #tpu.memory_space<vmem>>, vector<1x8x128xf32>
    %c0_6 = arith.constant 0 : index
    %c0_7 = arith.constant 0 : index
    %5 = vector.load %arg5[%c0_6, %c0_7] : memref<1x128xf32, #tpu.memory_space<vmem>>, vector<1x128xf32>
    %6 = arith.mulf %3, %4 : vector<1x8x128xf32>
    %cst = arith.constant dense<0.000000e+00> : vector<1x128xf32>
    %7 = vector.multi_reduction <add>, %6, %cst [1] : vector<1x8x128xf32> to vector<1x128xf32>
    %8 = arith.addf %5, %7 : vector<1x128xf32>
    %c0_8 = arith.constant 0 : index
    %c0_9 = arith.constant 0 : index
    %9 = vector.load %arg5[%c0_8, %c0_9] : memref<1x128xf32, #tpu.memory_space<vmem>>, vector<1x128xf32>
    tpu.vector_store %arg5[%c0_8, %c0_9], %8 {strides = array<i32>} : memref<1x128xf32, #tpu.memory_space<vmem>>, vector<1x128xf32>,
    %c0_10 = arith.constant 0 : index
    %c0_11 = arith.constant 0 : index
    %10 = vector.load %arg6[%c0_10, %c0_11] : memref<1x128xf32, #tpu.memory_space<vmem>>, vector<1x128xf32>
    %cst_12 = arith.constant dense<0.000000e+00> : vector<1x128xf32>
    %11 = vector.multi_reduction <add>, %3, %cst_12 [1] : vector<1x8x128xf32> to vector<1x128xf32>
    %12 = arith.addf %10, %11 : vector<1x128xf32>
    %c0_13 = arith.constant 0 : index
    %c0_14 = arith.constant 0 : index
    %13 = vector.load %arg6[%c0_13, %c0_14] : memref<1x128xf32, #tpu.memory_space<vmem>>, vector<1x128xf32>
    tpu.vector_store %arg6[%c0_13, %c0_14], %12 {strides = array<i32>} : memref<1x128xf32, #tpu.memory_space<vmem>>, vector<1x128xf32>,
    %c0_15 = arith.constant 0 : index
    %c0_16 = arith.constant 0 : index
    %14 = vector.load %arg7[%c0_15, %c0_16] : memref<1x128xf32, #tpu.memory_space<vmem>>, vector<1x128xf32>
    %cst_17 = arith.constant dense<0.000000e+00> : vector<1x128xf32>
    %15 = vector.multi_reduction <add>, %4, %cst_17 [1] : vector<1x8x128xf32> to vector<1x128xf32>
    %16 = arith.addf %14, %15 : vector<1x128xf32>
    %c0_18 = arith.constant 0 : index
    %c0_19 = arith.constant 0 : index
    %17 = vector.load %arg7[%c0_18, %c0_19] : memref<1x128xf32, #tpu.memory_space<vmem>>, vector<1x128xf32>
    tpu.vector_store %arg7[%c0_18, %c0_19], %16 {strides = array<i32>} : memref<1x128xf32, #tpu.memory_space<vmem>>, vector<1x128xf32>,
    %c0_i32_20 = arith.constant 0 : i32
    %18 = arith.cmpi eq, %arg1, %c0_i32_20 : i32
    %19 = arith.extui %18 : i1 to i32
    %c0_i32_21 = arith.constant 0 : i32
    %20 = arith.cmpi ne, %19, %c0_i32_21 : i32
    scf.if %20 {
      %c0_22 = arith.constant 0 : index
      %c0_23 = arith.constant 0 : index
      %21 = vector.load %arg5[%c0_22, %c0_23] : memref<1x128xf32, #tpu.memory_space<vmem>>, vector<1x128xf32>
      %cst_24 = arith.constant dense<0.000000e+00> : vector<1xf32>
      %22 = vector.multi_reduction <add>, %21, %cst_24 [1] : vector<1x128xf32> to vector<1xf32>
      %23 = vector.shape_cast %22 : vector<1xf32> to vector<1x1xf32>
      %c0_25 = arith.constant 0 : index
      %c0_26 = arith.constant 0 : index
      %24 = vector.load %arg6[%c0_25, %c0_26] : memref<1x128xf32, #tpu.memory_space<vmem>>, vector<1x128xf32>
      %cst_27 = arith.constant dense<0.000000e+00> : vector<1xf32>
      %25 = vector.multi_reduction <add>, %24, %cst_27 [1] : vector<1x128xf32> to vector<1xf32>
      %26 = vector.shape_cast %25 : vector<1xf32> to vector<1x1xf32>
      %c0_28 = arith.constant 0 : index
      %c0_29 = arith.constant 0 : index
      %27 = vector.load %arg7[%c0_28, %c0_29] : memref<1x128xf32, #tpu.memory_space<vmem>>, vector<1x128xf32>
      %cst_30 = arith.constant dense<0.000000e+00> : vector<1xf32>
      %28 = vector.multi_reduction <add>, %27, %cst_30 [1] : vector<1x128xf32> to vector<1xf32>
      %29 = vector.shape_cast %28 : vector<1xf32> to vector<1x1xf32>
      %30 = arith.subf %26, %23 : vector<1x1xf32>
      %31 = arith.subf %29, %23 : vector<1x1xf32>
      %cst_31 = arith.constant 1.000000e+00 : f32
      %32 = vector.broadcast %cst_31 : f32 to vector<1x1xf32>
      %33 = arith.addf %23, %32 : vector<1x1xf32>
      %cst_32 = arith.constant 5.000000e-01 : f32
      %34 = vector.broadcast %cst_32 : f32 to vector<1x1xf32>
      %35 = arith.mulf %34, %31 : vector<1x1xf32>
      %36 = arith.addf %23, %35 : vector<1x1xf32>
      %cst_33 = arith.constant 5.000000e-01 : f32
      %37 = vector.broadcast %cst_33 : f32 to vector<1x1xf32>
      %38 = arith.mulf %37, %30 : vector<1x1xf32>
      %39 = arith.addf %36, %38 : vector<1x1xf32>
      %cst_34 = arith.constant 1.000000e+00 : f32
      %40 = vector.broadcast %cst_34 : f32 to vector<1x1xf32>
      %41 = arith.addf %39, %40 : vector<1x1xf32>
      %42 = arith.divf %33, %41 : vector<1x1xf32>
      %cst_35 = arith.constant 1.000000e+00 : f32
      %43 = vector.broadcast %cst_35 : f32 to vector<1x1xf32>
      %44 = arith.subf %43, %42 : vector<1x1xf32>
      %cst_36 = arith.constant 0.000000e+00 : f32
      %45 = vector.broadcast %cst_36 : f32 to vector<1x1xf32>
      %46 = arith.cmpf ogt, %29, %45 : vector<1x1xf32>
      %cst_37 = arith.constant 1.000000e+00 : f32
      %47 = vector.broadcast %cst_37 : f32 to vector<1x1xf32>
      %48 = arith.mulf %47, %44 : vector<1x1xf32>
      %49 = arith.select %46, %44, %48 : vector<1x1xi1>, vector<1x1xf32>
      %50 = vector.shape_cast %49 : vector<1x1xf32> to vector<1x1x1xf32>
      %c0_38 = arith.constant 0 : index
      %c0_39 = arith.constant 0 : index
      %c0_40 = arith.constant 0 : index
      %51 = vector.load %arg4[%c0_38, %c0_39, %c0_40] : memref<1x1x1xf32, #tpu.memory_space<vmem>>, vector<1x1x1xf32>
      tpu.vector_store %arg4[%c0_38, %c0_39, %c0_40], %50 {strides = array<i32>} : memref<1x1x1xf32, #tpu.memory_space<vmem>>, vector<1x1x1xf32>,
    } else {
    }
    return
  }
  func.func @transform_0(%arg0: i32, %arg1: i32) -> (i32, i32, i32) {
    %c0_i32 = arith.constant 0 : i32
    %c0_i32_0 = arith.constant 0 : i32
    return %arg0, %arg1, %c0_i32 : i32, i32, i32
  }
  func.func @transform_1(%arg0: i32, %arg1: i32) -> (i32, i32, i32) {
    %c0_i32 = arith.constant 0 : i32
    %c0_i32_0 = arith.constant 0 : i32
    return %arg0, %arg1, %c0_i32 : i32, i32, i32
  }
  func.func @transform_2(%arg0: i32, %arg1: i32) -> (i32, i32, i32) {
    %c0_i32 = arith.constant 0 : i32
    %c0_i32_0 = arith.constant 0 : i32
    %c0_i32_1 = arith.constant 0 : i32
    return %arg0, %c0_i32, %c0_i32_0 : i32, i32, i32
  }
}

</mosaic_0001>

<bundles_post_ra>
// kernel: tpu_custom_call.1
= control target key start
LH: loop header
LB: loop body
LE: loop exit
PB: predicated region body
PF: predicated region fallthrough
CT: control target
= control target key end

     0   :  { %7 = vsyncpa [#allocation6], 0  ;;  %s752_s0 = inlined_call_operand.hbm [shape: f32[2,8,128], index: 0, kind: input, shape index: {}]   ;;  %s753_s1 = inlined_call_operand.hbm [shape: f32[2,8,128], index: 1, kind: input, shape index: {}]   ;;  %s754_s2 = inlined_call_operand.vmem [shape: f32[2,1,1], index: 2, kind: output, shape index: {}]  }
   0x1   :  { %9 = vsyncpa [#allocation6 + $0x1], 0 }
   0x2   :  { %10 = vsyncpa [#allocation8], 0 }
   0x3   :  { %12 = vsyncpa [#allocation8 + $0x1], 0  ;;  %s580_s9 = smov 0   ;;  %s582_s10 = smov 0  }
   0x4   :  { %s584_s11 = smov 0   ;;  %s586_s12 = smov 0  }
   0x5   :  { %s588_s13 = smov 0   ;;  %s590_s14 = smov 0  }
   0x6 LB: > { %s370_s15 = sadd.s32 4294967295, %s560_s14   ;;  %s30_s16 = sadd.s32 1, %s556_s13  ;;  %s560_s14 = sphi %s590_s14, %s18_s14   ;;  %s556_s13 = sphi %s588_s13, %s768_s13   ;;  %s552_s12 = sphi %s586_s12, %s767_s12   ;;  %s548_s11 = sphi %s584_s11, %s766_s11   ;;  %s544_s10 = sphi %s582_s10, %s765_s10   ;;  %s540_s9 = sphi %s580_s9, %s764_s9  }
   0x7   : > { %p32_p0 = scmp.ge.s32.totalorder %s30_s16, 2  ;;  %s39_s17 = sadd.s32 1, %s548_s11 }
   0x8   : > { %p46_p1 = scmp.ne.s32.totalorder %s548_s11, %s544_s10  ;;  %p47_p2 = scmp.eq.s32.totalorder %s560_s14, 0 }
   0x9   : > { %s770_s16 = smov (%p32_p0, %s30_s16), 0  ;;  %p52_p4 = scmp.ne.s32.totalorder %s544_s10, %s540_s9 }
   0xa   : > { %p616_p3 = por %p47_p2, %p46_p1  ;;  %s34_s19 = ssub.s32 %s556_s13, %s770_s16 }
   0xb   : > { %p53_p5 = scmp.eq.s32.totalorder %s370_s15, 0  ;;  %p37_p6 = scmp.eq.s32.totalorder %s34_s19, 0 }
   0xc   : > { %p394_p8 = scmp.lt.s32.totalorder %s560_s14, 2  ;;  %s632_s22 = sand.u32 1, %s548_s11  }
   0xd   : > { %p623_p7 = por %p53_p5, %p52_p4  ;;  %s375_s23 = sshll.u32 %s556_s13, 7 }
   0xe   : > { %s629_s21 = scalar_select %p37_p6, %s548_s11, %s39_s17  }
   0xf   : > { %s757_s20 = scalar_select %p623_p7, 1, 0 }
  0x10   : > { %s374_s24 = sshll.u32 %s632_s22, 3  ;;  %s641_s27 = scalar_lea.hbm %s752_s0, %s375_s23 }
  0x11   : > { %s134_s28 = scalar_lea.vmem [#allocation5], %s374_s24  ;;  %p647_p9 = pnand %p394_p8, %p616_p3 }
  0x12   : > { %s142_s29 = sshll.u32 %s134_s28, 4  ;;  %s131_s3 = scalar_lea.sflag [#allocation6], %s632_s22  ;;  %s651_s29 = int_to_ptr.vmem [resolvable:$true] %s142_s29 }
  0x13   : > { %s446_s4 = scalar_lea.hbm %s641_s27, 128  ;;  %p448_p13 = pneg %p647_p9 }
  0x14   : > { %p447_p12 = scmp.ne.s32.totalorder %s641_s27, %s446_s4  ;;  %s451_s7 = scalar_lea.hbm %s752_s0, 256 }
  0x15   : > { %p452_p2 = scmp.lt.u32.totalorder %s641_s27, %s752_s0  ;;  %p453_p3 = scmp.lt.u32.totalorder %s451_s7, %s446_s4 }
  0x16   : > { %p449_p0 = pnand %p448_p13, %p447_p12  ;;  %p455_p5 = scmp.lt.u32.totalorder %s446_s4, %s641_s27 }
  0x17   : > { %p454_p4 = por %p453_p3, %p452_p2 }
  0x18   : > { %p450_p1 = pneg %p449_p0 }
  0x19   : > { %p456_p6 = por %p455_p5, %p454_p4 }
  0x1b   : > { %p457_p8 = pnand %p456_p6, %p450_p1 }
  0x1d   : > { %460 = shalt.err (!%p457_p8)
}
  0x1e   : > { %s461_s15 = scalar_lea.vmem %s651_s29, 128  ;;  %s562_s17 = smov [#allocation5]  }
  0x1f   : > { %p462_p12 = scmp.ne.s32.totalorder %s651_s29, %s461_s15  ;;  %s466_s18 = sshll.u32 %s562_s17, 4  ;;  %s467_s18 = int_to_ptr.vmem [resolvable:$false] %s466_s18 }
  0x20   : > { %s468_s19 = scalar_lea.vmem %s467_s18, 256  ;;  %p469_p11 = scmp.lt.s32.totalorder %s651_s29, %s467_s18 }
  0x21   : > { %p464_p0 = pnand %p462_p12, %p448_p13  ;;  %p470_p2 = scmp.lt.s32.totalorder %s468_s19, %s461_s15 }
  0x23   : > { %p465_p10 = pneg %p464_p0  ;;  %p471_p3 = por %p470_p2, %p469_p11 }
  0x25   : > { %p472_p4 = pnand %p471_p3, %p465_p10 }
  0x27   : > { %475 = shalt.err (!%p472_p4)
}
  0x28   : > { %390 = dma.hbm_to_vmem [thread:$0]  (!%p647_p9), %s641_s27, 128, %s651_s29, %s131_s3  }
  0x29   : > { %p759_p1 = scmp.lt.s32.totalorder %s560_s14, 3  ;;  %p760_p5 = scmp.ge.s32.totalorder %s560_s14, 1 }
  0x2a   : > { %s694_s4 = scalar_lea.hbm %s753_s1, %s375_s23  ;;  %s153_s5 = scalar_lea.vmem [#allocation7], %s374_s24 }
  0x2b   : > { %p685_p6 = pnand %p760_p5, %p759_p1  ;;  %s161_s6 = sshll.u32 %s153_s5, 4  ;;  %s162_s6 = int_to_ptr.vmem [resolvable:$true] %s161_s6 }
  0x2c   : > { %s150_s27 = scalar_lea.sflag [#allocation8], %s632_s22  ;;  %s476_s29 = scalar_lea.hbm %s694_s4, 128 }
  0x2d   : > { %s761_s25 = scalar_select %p685_p6, 1, 0 }
  0x2e   : > { %p477_p10 = scmp.ne.s32.totalorder %s694_s4, %s476_s29  ;;  %s481_s23 = scalar_lea.hbm %s753_s1, 256 }
  0x2f   : > { %p482_p12 = scmp.lt.u32.totalorder %s694_s4, %s753_s1  ;;  %p483_p0 = scmp.lt.u32.totalorder %s481_s23, %s476_s29 }
  0x30   : > { %p479_p11 = pnand %p477_p10, %p448_p13  ;;  %p485_p3 = scmp.lt.u32.totalorder %s476_s29, %s694_s4 }
  0x31   : > { %p484_p2 = por %p483_p0, %p482_p12 }
  0x32   : > { %p480_p8 = pneg %p479_p11 }
  0x33   : > { %p486_p4 = por %p485_p3, %p484_p2 }
  0x35   : > { %p487_p1 = pnand %p486_p4, %p480_p8 }
  0x37   : > { %490 = shalt.err (!%p487_p1)
}
  0x38   : > { %s491_s22 = scalar_lea.vmem %s162_s6, 128  ;;  %s563_s24 = smov [#allocation7]  }
  0x39   : > { %p492_p5 = scmp.ne.s32.totalorder %s162_s6, %s491_s22  ;;  %s496_s15 = sshll.u32 %s563_s24, 4  ;;  %s497_s15 = int_to_ptr.vmem [resolvable:$false] %s496_s15 }
  0x3a   : > { %s498_s17 = scalar_lea.vmem %s497_s15, 256  ;;  %p499_p7 = scmp.lt.s32.totalorder %s162_s6, %s497_s15 }
  0x3b   : > { %p494_p10 = pnand %p492_p5, %p448_p13  ;;  %p500_p6 = scmp.lt.s32.totalorder %s498_s17, %s491_s22 }
  0x3d   : > { %p495_p11 = pneg %p494_p10  ;;  %p501_p0 = por %p500_p6, %p499_p7 }
  0x3f   : > { %p502_p12 = pnand %p501_p0, %p495_p11 }
  0x41   : > { %505 = shalt.err (!%p502_p12)
}
  0x42   : > { %393 = dma.hbm_to_vmem [thread:$0]  (!%p647_p9), %s694_s4, 128, %s162_s6, %s150_s27  }
  0x43   : > { %p762_p8 = scmp.ne.s32.totalorder %s761_s25, 0 }
  0x44   : > { %s172_s18 = sand.u32 (!%p762_p8), 1, %s544_s10   ;;  %p763_p13 = scmp.ne.s32.totalorder (!%p762_p8), %s757_s20, 0 }
  0x45   : > { %170 = sbr.rel (%p762_p8) target bundleno = 277 (0x115), region = 28  ;;  %s379_s19 = sshll.u32 (!%p762_p8), %s172_s18, 3 }
  0x46   : > { %s173_s26 = scalar_lea.sflag (!%p762_p8), [#allocation6], %s172_s18  ;;  %s176_s28 = scalar_lea.vmem (!%p762_p8), [#allocation5], %s379_s19 }
  0x4c   : > { %531 = dma.done.wait (%p763_p13), %s173_s26, 128  }
  0x4d   : > { %533 = vsyncadd (%p763_p13), %s173_s26, 4294967168  ;;  %s182_s5 = scalar_lea.sflag [#allocation8], %s172_s18  ;;  %s185_s29 = scalar_lea.vmem [#allocation7], %s379_s19 }
  0x4e   : > { %535 = dma.done.wait (%p763_p13), %s182_s5, 128  }
  0x4f   : > { %537 = vsyncadd (%p763_p13), %s182_s5, 4294967168  ;;  %v564_v0 = vmov 0.0   ;;  %v219_v1 = vld [vmem:[%s176_s28] sm:$0xff]  ;;  %v220_v2 = vld [vmem:[%s185_s29] sm:$0xff]  ;;  %vm253_vm0 = vcmask 1040384   ;;  %p209_p7 = scmp.lt.s32.totalorder %s552_s12, 1 }
  0x50   : > { %217 = vst [vmem:[#allocation3] sm:$0x1] %v564_v0  ;;  %216 = vst [vmem:[#allocation2] sm:$0x1] %v564_v0  ;;  %v232_v3 = vrot.slane %v219_v1, 4  ;;  %v222_v4 = vmul.f32 %v220_v2, %v219_v1  ;;  %v241_v5 = vrot.slane %v220_v2, 4 }
  0x51   : > { %218 = vst [vmem:[#allocation4] sm:$0x1] %v564_v0  ;;  %s772_s12 = smov (!%p209_p7, %s552_s12), 1  ;;  %vm276_vm1 = vcmask 0  }
  0x52   : > { %v233_v6 = vadd.f32 %v232_v3, %v219_v1  ;;  %v223_v7 = vrot.slane %v222_v4, 4  ;;  %v242_v8 = vadd.f32 %v241_v5, %v220_v2  ;;  %s211_s25 = scalar_lea.vmem %s754_s2, %s772_s12 }
  0x54   : > { %v234_v9 = vrot.slane %v233_v6, 2  ;;  %v224_v10 = vadd.f32 %v223_v7, %v222_v4  ;;  %v243_v11 = vrot.slane %v242_v8, 2 }
  0x56   : > { %v235_v12 = vadd.f32 %v234_v9, %v233_v6  ;;  %v225_v13 = vrot.slane %v224_v10, 2  ;;  %v244_v14 = vadd.f32 %v243_v11, %v242_v8 }
  0x57   : > { %v231_v18 = vld [vmem:[#allocation3] sm:$0x1]  ;;  %v221_v23 = vld [vmem:[#allocation2] sm:$0x1] }
  0x58   : > { %v236_v15 = vrot.slane %v235_v12, 1  ;;  %v226_v16 = vadd.f32 %v225_v13, %v224_v10  ;;  %v245_v17 = vrot.slane %v244_v14, 1  ;;  %v240_v19 = vld [vmem:[#allocation4] sm:$0x1] }
  0x5a   : > { %v237_v20 = vadd.f32 %v236_v15, %v235_v12  ;;  %v227_v21 = vrot.slane %v226_v16, 1  ;;  %v246_v22 = vadd.f32 %v245_v17, %v244_v14 }
  0x5c   : > { %v238_v24 = vadd.f32 %v237_v20, %v231_v18  ;;  %v228_v25 = vadd.f32 %v227_v21, %v226_v16  ;;  %v247_v26 = vadd.f32 %v246_v22, %v240_v19 }
  0x5e   : > { %239 = vst [vmem:[#allocation3] sm:$0x1] %v238_v24  ;;  %v229_v27 = vadd.f32 %v228_v25, %v221_v23  ;;  %248 = vst [vmem:[#allocation4] sm:$0x1] %v247_v26 }
  0x60   : > { %230 = vst [vmem:[#allocation2] sm:$0x1] %v229_v27 }
  0x65   : > { %v257_v28 = vld [vmem:[#allocation3] sm:$0x1]  ;;  %v261_v31 = vld [vmem:[#allocation4] sm:$0x1] }
  0x66   : > { %v258_v29 = vsel %vm253_vm0, %v257_v28, 0.0  ;;  %v262_v33 = vsel %vm253_vm0, %v261_v31, 0.0 }
  0x67   : > { %259 = vadd.xlane.f32.xlu1 %v258_v29  ;;  %v252_v30 = vld [vmem:[#allocation2] sm:$0x1] }
  0x68   : > { %v254_v32 = vsel %vm253_vm0, %v252_v30, 0.0 }
  0x69   : > { %255 = vadd.xlane.f32.xlu0 %v254_v32 }
  0x6d   : > { %263 = vadd.xlane.f32.xlu0 %v262_v33 }
  0xf4   : > { %v260_v35 = vpop.xlane.xlu1 %259 }
  0xf6   : > { %v256_v34 = vpop.xlane.xlu0 %255 }
  0xf7   : > { %v265_v37 = vsub.f32 %v260_v35, %v256_v34  ;;  %v267_v44 = vadd.f32 1.0, %v256_v34 }
  0xf9   : > { %v270_v40 = vmul.f32 0.5, %v265_v37 }
  0xfa   : > { %v264_v36 = vpop.xlane.xlu0 %263 }
  0xfb   : > { %v266_v38 = vsub.f32 %v264_v36, %v256_v34 }
  0xfd   : > { %v268_v39 = vmul.f32 0.5, %v266_v38 }
  0xff   : > { %v269_v41 = vadd.f32 %v268_v39, %v256_v34 }
 0x101   : > { %v271_v42 = vadd.f32 %v270_v40, %v269_v41 }
 0x103   : > { %v272_v43 = vadd.f32 1.0, %v271_v42 }
 0x105   : > { %444 = vrcp.f32 %v272_v43 }
 0x10f   : > { %v445_v45 = vpop.eup %444 }
 0x110   : > { %v274_v46 = vmul.f32 %v445_v45, %v267_v44 }
 0x112   : > { %v275_v47 = vsub.f32 1.0, %v274_v46 }
 0x114   : > { %277 = vst.msk [vmem:[%s211_s25] sm:$0x1] %vm276_vm1, %v275_v47 }
 0x115 PF: > { %s18_s14 = sadd.s32 1, %s560_s14   ;;  %s764_s9 = smov %s544_s10 }
 0x116   : > { %p15_p9 = scmp.ge.s32.totalorder %s18_s14, 4   ;;  %s765_s10 = smov %s548_s11 }
 0x117   : > { %s766_s11 = smov %s629_s21  ;;  %s767_s12 = smov %s556_s13 }
 0x118   : > { %s768_s13 = smov %s770_s16  ;;  %17 = sbr.rel (!%p15_p9) target bundleno = 6 (0x6), region = 89 }
 0x11f   :  { %295 = vsyncpa [#allocation6], 1 }
 0x120   :  { %297 = vsyncpa [#allocation6 + $0x1], 1 }
 0x121   :  { %298 = vsyncpa [#allocation8], 1 }
 0x122   :  { %300 = vsyncpa [#allocation8 + $0x1], 1 }

</bundles_post_ra>
